<compile_context>
chip_gen: v6e
topology: v6e:2x2x1
jax: 0.10.0
libtpu: 0.0.40
codegen_flags: <defaults>
</compile_context>

<pallas_src>
import functools

import jax
import jax.numpy as jnp
from jax import lax
from jax.experimental import pallas as pl
from jax.experimental.pallas import tpu as pltpu


def _projection_kernel(patches_ref, logits_ref, w1_ref, b1_ref, w2_ref,
                       b2_ref, out_ref, *, batch, hw):
    """Single grid-less invocation; every ref is a whole VMEM-resident array.

    patches_ref : (Kpad, B*HW)  im2col of the raw spatial priors (K padded)
    logits_ref  : (B, Cout, HW)
    w1_ref      : (Cmid, Kpad)  3x3 conv weights, tap-major, K-padded
    b1_ref      : (Cmid, 1)
    w2_ref      : (Cout, Cmid)  1x1 conv weights with ensemble w folded in
    b2_ref      : (Cout, 1)     1x1 conv bias with ensemble w folded in
    out_ref     : (B, Cout, HW)
    """
    # One matmul per layer over all batches at once (N = B*HW lanes).
    hidden = jnp.dot(w1_ref[...], patches_ref[...],
                     preferred_element_type=jnp.float32) + b1_ref[...]
    hidden = jnp.maximum(hidden, 0.0)                         # ReLU
    proj = jnp.dot(w2_ref[...], hidden.astype(w2_ref.dtype),
                   preferred_element_type=jnp.float32) + b2_ref[...]
    # Per-batch weighted-ensemble add/store.  hw % 128 == 0, so each lane
    # slice starts on a lane-tile boundary and the stores are lane-dense.
    for b in range(batch):
        out_ref[b] = logits_ref[b] + proj[:, b * hw:(b + 1) * hw]


def prepare_projection_params(params, *, matmul_dtype=jnp.float32):
    """One-time parameter preprocessing (hoisted out of the per-call forward).

    Set matmul_dtype=jnp.bfloat16 on v5e to halve the dominant patches DMA
    (accumulation stays f32); this loosens numerical tolerance.
    """
    f32 = jnp.float32
    kh, kw, cin, cmid = params["w1"].shape
    cout = params["w2"].shape[-1]
    k = kh * kw * cin
    k_pad = ((k + 7) // 8) * 8          # 189 -> 192: exact sublane tiling

    # (3,3,Cin,Cmid) -> tap-major (Cmid, 9*Cin), zero-padded to (Cmid, Kpad).
    w1_mat = jnp.transpose(params["w1"].astype(f32),
                           (3, 0, 1, 2)).reshape(cmid, k)
    w1_mat = jnp.pad(w1_mat, ((0, 0), (0, k_pad - k)))
    b1 = params["b1"].reshape(cmid, 1).astype(f32)

    # Fold the learnable ensemble weights into the 1x1 conv.
    ens_w = params["ens_w"].astype(f32)                        # (Cout,)
    w2_eff = (params["w2"].astype(f32) * ens_w[None, :]).T      # (Cout, Cmid)
    b2_eff = (params["b2"].astype(f32) * ens_w).reshape(cout, 1)

    return {
        "w1_mat": w1_mat.astype(matmul_dtype),
        "b1": b1,
        "w2_eff": w2_eff.astype(matmul_dtype),
        "b2_eff": b2_eff,
    }


def projection_module_forward(logits_nchw, spatial_priors_raw_nchw, prepared):
    """Pallas forward pass. Inputs are NCHW (PyTorch convention)."""
    B, Cout, H, W = logits_nchw.shape
    Cin = spatial_priors_raw_nchw.shape[1]
    HW = H * W
    f32 = jnp.float32

    w1_mat = prepared["w1_mat"]
    b1 = prepared["b1"]
    w2_eff = prepared["w2_eff"]
    b2_eff = prepared["b2_eff"]
    Cmid, Kpad = w1_mat.shape
    K = 9 * Cin
    mm_dtype = w1_mat.dtype

    # NCHW -> (B, C, H*W): a free, contiguous reshape (no transpose).
    logits = logits_nchw.reshape(B, Cout, HW).astype(f32)

    # im2col for the 3x3 / padding=1 conv with batch folded into lanes:
    #   patches[(ky*3+kx)*Cin + c, b*HW + h*W + w] = priors[b, c, h+ky-1, w+kx-1]
    # Built at trace time; allow_input_fusion below lets XLA fuse this
    # producer into the pallas_call's first operand instead of materializing
    # the (Kpad, B*HW) array in HBM.
    priors = spatial_priors_raw_nchw.astype(mm_dtype)
    pad = jnp.pad(priors, ((0, 0), (0, 0), (1, 1), (1, 1)))
    taps = [pad[:, :, ky:ky + H, kx:kx + W]
            for ky in range(3) for kx in range(3)]
    patches = jnp.concatenate(taps, axis=1).reshape(B, K, HW)
    patches = jnp.moveaxis(patches, 0, 1).reshape(K, B * HW)
    patches = jnp.pad(patches, ((0, Kpad - K), (0, 0)))

    esize = jnp.dtype(mm_dtype).itemsize
    flops = 2 * B * HW * (Cmid * Kpad + Cout * Cmid)
    bytes_accessed = (esize * (Kpad * B * HW + Cmid * Kpad + Cout * Cmid)
                      + 4 * (2 * B * Cout * HW + Cmid + Cout))

    kernel = functools.partial(_projection_kernel, batch=B, hw=HW)
    out = pl.pallas_call(
        kernel,
        out_shape=jax.ShapeDtypeStruct((B, Cout, HW), f32),
        # Whole arrays, single invocation, all VMEM-resident (<1 MiB total,
        # fits every generation including v7x's 64 MiB scoped VMEM).
        in_specs=[pl.BlockSpec(memory_space=pltpu.MemorySpace.VMEM)] * 6,
        out_specs=pl.BlockSpec(memory_space=pltpu.MemorySpace.VMEM),
        cost_estimate=pl.CostEstimate(flops=flops, transcendentals=0,
                                      bytes_accessed=bytes_accessed),
        compiler_params=pltpu.CompilerParams(
            # Allow the im2col producer fusion on operand 0 (patches).
            allow_input_fusion=[True, False, False, False, False, False],
        ),
    )(patches, logits, w1_mat, b1, w2_eff, b2_eff)

    # (B, Cout, H*W) -> NCHW, again a free reshape.
    return {"weighted_ensemble": out.reshape(B, Cout, H, W)}


def _reference_forward(logits_nchw, priors_nchw, params):
    """Pure-JAX reference (lax.conv) for a correctness check."""
    # conv1: 3x3, padding=1, NCHW with OIHW weights
    w1_oihw = jnp.transpose(params["w1"], (3, 2, 0, 1))   # (Cmid, Cin, 3, 3)
    h = lax.conv_general_dilated(priors_nchw, w1_oihw, (1, 1), "SAME")
    h = h + params["b1"].reshape(1, -1, 1, 1)
    h = jnp.maximum(h, 0.0)
    # conv2: 1x1
    w2_oihw = jnp.transpose(params["w2"], (1, 0))[:, :, None, None]
    sp = lax.conv_general_dilated(h, w2_oihw, (1, 1), "VALID")
    sp = sp + params["b2"].reshape(1, -1, 1, 1)
    return logits_nchw + params["ens_w"].reshape(1, -1, 1, 1) * sp


if __name__ == "__main__":
    num_classes = 4
    in_channels = 21
    cmid = 32
    B, H, W = 2, 16, 16

    key = jax.random.PRNGKey(0)
    k = jax.random.split(key, 7)
    # Deterministic synthetic parameters (matching nn.Module shapes).
    params = {
        "w1": jax.random.normal(k[0], (3, 3, in_channels, cmid), jnp.float32) * 0.05,
        "b1": jax.random.normal(k[1], (cmid,), jnp.float32) * 0.05,
        "w2": jax.random.normal(k[2], (cmid, num_classes), jnp.float32) * 0.05,
        "b2": jax.random.normal(k[3], (num_classes,), jnp.float32) * 0.05,
        "ens_w": jnp.full((num_classes,), 1.0, jnp.float32),  # torch.full((1,C,1,1), 1.0)
    }

    logits = jax.random.normal(k[4], (B, num_classes, H, W), jnp.float32)
    spatial_priors_raw = jax.random.normal(k[5], (B, in_channels, H, W), jnp.float32)

    # One-time weight preprocessing, done outside the per-call forward.
    prepared = prepare_projection_params(params)

    fwd = jax.jit(projection_module_forward)
    out = fwd(logits, spatial_priors_raw, prepared)
    ens = jax.block_until_ready(out["weighted_ensemble"])

    ref = _reference_forward(logits, spatial_priors_raw, params)
    assert ens.shape == (B, num_classes, H, W)
    assert jnp.allclose(ens, ref, atol=1e-4, rtol=1e-4), "mismatch vs reference"

    print("KERNEL_OK")
</pallas_src>

<mosaic_0001>
module attributes {stable_mosaic.version = 11 : i64} {
  func.func @_projection_kernel(%arg0: memref<192x512xf32, #tpu.memory_space<vmem>>, %arg1: memref<2x4x256xf32, #tpu.memory_space<vmem>>, %arg2: memref<32x192xf32, #tpu.memory_space<vmem>>, %arg3: memref<32x1xf32, #tpu.memory_space<vmem>>, %arg4: memref<4x32xf32, #tpu.memory_space<vmem>>, %arg5: memref<4x1xf32, #tpu.memory_space<vmem>>, %arg6: memref<2x4x256xf32, #tpu.memory_space<vmem>>) attributes {dimension_semantics = [], scalar_prefetch = 0 : i64, scratch_operands = 0 : i64, tpu.core_type = #tpu.core_type<tc>} {
    %c0 = arith.constant 0 : index
    %c0_0 = arith.constant 0 : index
    %0 = vector.load %arg2[%c0, %c0_0] : memref<32x192xf32, #tpu.memory_space<vmem>>, vector<32x192xf32>
    %c0_1 = arith.constant 0 : index
    %c0_2 = arith.constant 0 : index
    %1 = vector.load %arg0[%c0_1, %c0_2] : memref<192x512xf32, #tpu.memory_space<vmem>>, vector<192x512xf32>
    %cst = arith.constant dense<0.000000e+00> : vector<32x512xf32>
    %2 = tpu.matmul %0, %1, %cst {dimension_numbers = #tpu.dot_dimension_numbers<[1], [0], [0], [1], [0, 0, 1, 1], [], []>} : vector<32x192xf32>, vector<192x512xf32>, vector<32x512xf32> -> vector<32x512xf32>
    %c0_3 = arith.constant 0 : index
    %c0_4 = arith.constant 0 : index
    %3 = vector.load %arg3[%c0_3, %c0_4] : memref<32x1xf32, #tpu.memory_space<vmem>>, vector<32x1xf32>
    %4 = vector.broadcast %3 : vector<32x1xf32> to vector<32x512xf32>
    %5 = arith.addf %2, %4 : vector<32x512xf32>
    %cst_5 = arith.constant 0.000000e+00 : f32
    %6 = vector.broadcast %cst_5 : f32 to vector<32x512xf32>
    %7 = arith.maximumf %5, %6 : vector<32x512xf32>
    %c0_6 = arith.constant 0 : index
    %c0_7 = arith.constant 0 : index
    %8 = vector.load %arg4[%c0_6, %c0_7] : memref<4x32xf32, #tpu.memory_space<vmem>>, vector<4x32xf32>
    %cst_8 = arith.constant dense<0.000000e+00> : vector<4x512xf32>
    %9 = tpu.matmul %8, %7, %cst_8 {dimension_numbers = #tpu.dot_dimension_numbers<[1], [0], [0], [1], [0, 0, 1, 1], [], []>} : vector<4x32xf32>, vector<32x512xf32>, vector<4x512xf32> -> vector<4x512xf32>
    %c0_9 = arith.constant 0 : index
    %c0_10 = arith.constant 0 : index
    %10 = vector.load %arg5[%c0_9, %c0_10] : memref<4x1xf32, #tpu.memory_space<vmem>>, vector<4x1xf32>
    %11 = vector.broadcast %10 : vector<4x1xf32> to vector<4x512xf32>
    %12 = arith.addf %9, %11 : vector<4x512xf32>
    %c0_11 = arith.constant 0 : index
    %c0_12 = arith.constant 0 : index
    %c0_13 = arith.constant 0 : index
    %13 = vector.load %arg1[%c0_11, %c0_12, %c0_13] : memref<2x4x256xf32, #tpu.memory_space<vmem>>, vector<1x4x256xf32>
    %14 = vector.shape_cast %13 : vector<1x4x256xf32> to vector<4x256xf32>
    %15 = vector.extract_strided_slice %12 {offsets = [0, 0], sizes = [4, 256], strides = [1, 1]} : vector<4x512xf32> to vector<4x256xf32>
    %16 = arith.addf %14, %15 : vector<4x256xf32>
    %c0_14 = arith.constant 0 : index
    %c0_15 = arith.constant 0 : index
    %c0_16 = arith.constant 0 : index
    %17 = vector.load %arg6[%c0_14, %c0_15, %c0_16] : memref<2x4x256xf32, #tpu.memory_space<vmem>>, vector<1x4x256xf32>
    %18 = vector.shape_cast %17 : vector<1x4x256xf32> to vector<4x256xf32>
    %19 = vector.shape_cast %16 : vector<4x256xf32> to vector<1x4x256xf32>
    tpu.vector_store %arg6[%c0_14, %c0_15, %c0_16], %19 {strides = array<i32>} : memref<2x4x256xf32, #tpu.memory_space<vmem>>, vector<1x4x256xf32>,
    %c1 = arith.constant 1 : index
    %c0_17 = arith.constant 0 : index
    %c0_18 = arith.constant 0 : index
    %20 = vector.load %arg1[%c1, %c0_17, %c0_18] : memref<2x4x256xf32, #tpu.memory_space<vmem>>, vector<1x4x256xf32>
    %21 = vector.shape_cast %20 : vector<1x4x256xf32> to vector<4x256xf32>
    %22 = vector.extract_strided_slice %12 {offsets = [0, 256], sizes = [4, 256], strides = [1, 1]} : vector<4x512xf32> to vector<4x256xf32>
    %23 = arith.addf %21, %22 : vector<4x256xf32>
    %c1_19 = arith.constant 1 : index
    %c0_20 = arith.constant 0 : index
    %c0_21 = arith.constant 0 : index
    %24 = vector.load %arg6[%c1_19, %c0_20, %c0_21] : memref<2x4x256xf32, #tpu.memory_space<vmem>>, vector<1x4x256xf32>
    %25 = vector.shape_cast %24 : vector<1x4x256xf32> to vector<4x256xf32>
    %26 = vector.shape_cast %23 : vector<4x256xf32> to vector<1x4x256xf32>
    tpu.vector_store %arg6[%c1_19, %c0_20, %c0_21], %26 {strides = array<i32>} : memref<2x4x256xf32, #tpu.memory_space<vmem>>, vector<1x4x256xf32>,
    return
  }
}

</mosaic_0001>

<bundles_post_ra>
// kernel: projection_module_forward.2
= control target key start
LH: loop header
LB: loop body
LE: loop exit
PB: predicated region body
PF: predicated region fallthrough
CT: control target
= control target key end

     0   :  { %v1037_v37 = vlaneseq  ;;  %vm1207_vm1 = vcmask 523264   ;;  %vm1421_vm2 = vcmask 261120   ;;  %s2103_s0 = inlined_call_operand.vmem [shape: f32[2,4,256], index: 0, kind: input, shape index: {}]   ;;  %s2104_s1 = inlined_call_operand.vmem [shape: f32[32,192], index: 1, kind: input, shape index: {}]   ;;  %s2105_s2 = inlined_call_operand.vmem [shape: f32[32,1], index: 2, kind: input, shape index: {}]   ;;  %s2106_s3 = inlined_call_operand.vmem [shape: f32[4,32], index: 3, kind: input, shape index: {}]   ;;  %s2107_s4 = inlined_call_operand.vmem [shape: f32[4,1], index: 4, kind: input, shape index: {}]   ;;  %s2108_s5 = inlined_call_operand.vmem [shape: f32[189,512], index: 5, kind: input, shape index: {}]   ;;  %s2109_s6 = inlined_call_operand.<no memory space> [shape: f32[], index: 6, kind: input, shape index: {}]   ;;  %s2110_s7 = inlined_call_operand.vmem [shape: f32[2,4,256], index: 7, kind: output, shape index: {}]  }
   0x1   :  { %v1743_v0 = vstv %s2109_s6  ;;  %v1647_v1 = vld [vmem:[%s2108_s5 + $0x1e8] sm:$0xff]  ;;  %v1649_v2 = vld [vmem:[%s2108_s5 + $0x1f8] sm:$0xff]  ;;  %v1646_v3 = vld [vmem:[%s2108_s5 + $0x1e0] sm:$0xff] }
   0x2   :  { %1220 = vmatprep.subr.mxu0 %v1647_v1  ;;  %1309 = vmatprep.subr.mxu1 %v1649_v2  ;;  %v1648_v4 = vld [vmem:[%s2108_s5 + $0x1f0] sm:$0xff]  ;;  %v1643_v5 = vld [vmem:[%s2108_s5 + $0x1c8] sm:$0xff]  ;;  %v1645_v6 = vld [vmem:[%s2108_s5 + $0x1d8] sm:$0xff]  ;;  %v1038_v46 = vshrl.u32 %v1037_v37, 7 }
   0x3   :  { %1221 = vmatpush1.msra.mxu0 %v1646_v3  ;;  %1310 = vmatpush1.msra.mxu1 %v1648_v4  ;;  %v1642_v7 = vld [vmem:[%s2108_s5 + $0x1c0] sm:$0xff]  ;;  %v1644_v8 = vld [vmem:[%s2108_s5 + $0x1d0] sm:$0xff]  ;;  %v1639_v9 = vld [vmem:[%s2108_s5 + $0x1a8] sm:$0xff] }
   0x4   :  { %1222 = vmatprep.subr.mxu0 %v1643_v5  ;;  %1311 = vmatprep.subr.mxu1 %v1645_v6  ;;  %v1641_v10 = vld [vmem:[%s2108_s5 + $0x1b8] sm:$0xff]  ;;  %v1638_v11 = vld [vmem:[%s2108_s5 + $0x1a0] sm:$0xff]  ;;  %v1640_v12 = vld [vmem:[%s2108_s5 + $0x1b0] sm:$0xff]  ;;  %v1039_v55 = vadd.s32 184, %v1038_v46 }
   0x5   :  { %1223 = vmatpush1.msra.mxu0 %v1642_v7  ;;  %1312 = vmatpush1.msra.mxu1 %v1644_v8  ;;  %v1635_v13 = vld [vmem:[%s2108_s5 + $0x188] sm:$0xff]  ;;  %v1637_v14 = vld [vmem:[%s2108_s5 + $0x198] sm:$0xff]  ;;  %v1634_v15 = vld [vmem:[%s2108_s5 + $0x180] sm:$0xff] }
   0x6   :  { %1224 = vmatprep.subr.mxu0 %v1639_v9  ;;  %1313 = vmatprep.subr.mxu1 %v1641_v10  ;;  %v1636_v16 = vld [vmem:[%s2108_s5 + $0x190] sm:$0xff]  ;;  %v1631_v17 = vld [vmem:[%s2108_s5 + $0x168] sm:$0xff]  ;;  %v1633_v18 = vld [vmem:[%s2108_s5 + $0x178] sm:$0xff]  ;;  %vm1040_vm0 = vcmp.lt.s32.totalorder %v1039_v55, 189 }
   0x7   :  { %1225 = vmatpush1.msra.mxu0 %v1638_v11  ;;  %1314 = vmatpush1.msra.mxu1 %v1640_v12  ;;  %v1630_v19 = vld [vmem:[%s2108_s5 + $0x160] sm:$0xff]  ;;  %v1632_v20 = vld [vmem:[%s2108_s5 + $0x170] sm:$0xff]  ;;  %v1627_v21 = vld [vmem:[%s2108_s5 + $0x148] sm:$0xff] }
   0x8   :  { %1226 = vmatprep.subr.mxu0 %v1635_v13  ;;  %1315 = vmatprep.subr.mxu1 %v1637_v14  ;;  %v1629_v22 = vld [vmem:[%s2108_s5 + $0x158] sm:$0xff]  ;;  %v1626_v23 = vld [vmem:[%s2108_s5 + $0x140] sm:$0xff]  ;;  %v1628_v24 = vld [vmem:[%s2108_s5 + $0x150] sm:$0xff] }
   0x9   :  { %1227 = vmatpush1.msra.mxu0 %v1634_v15  ;;  %1316 = vmatpush1.msra.mxu1 %v1636_v16  ;;  %v1623_v25 = vld [vmem:[%s2108_s5 + $0x128] sm:$0xff]  ;;  %v1625_v26 = vld [vmem:[%s2108_s5 + $0x138] sm:$0xff]  ;;  %v1622_v27 = vld [vmem:[%s2108_s5 + $0x120] sm:$0xff] }
   0xa   :  { %1228 = vmatprep.subr.mxu0 %v1631_v17  ;;  %1317 = vmatprep.subr.mxu1 %v1633_v18  ;;  %v1624_v28 = vld [vmem:[%s2108_s5 + $0x130] sm:$0xff]  ;;  %v1619_v29 = vld [vmem:[%s2108_s5 + $0x108] sm:$0xff]  ;;  %v1621_v30 = vld [vmem:[%s2108_s5 + $0x118] sm:$0xff] }
   0xb   :  { %1229 = vmatpush1.msra.mxu0 %v1630_v19  ;;  %1318 = vmatpush1.msra.mxu1 %v1632_v20  ;;  %v1618_v31 = vld [vmem:[%s2108_s5 + $0x100] sm:$0xff]  ;;  %v1620_v32 = vld [vmem:[%s2108_s5 + $0x110] sm:$0xff]  ;;  %v1615_v33 = vld [vmem:[%s2108_s5 + $0xe8] sm:$0xff] }
   0xc   :  { %1230 = vmatprep.subr.mxu0 %v1627_v21  ;;  %1319 = vmatprep.subr.mxu1 %v1629_v22  ;;  %v1617_v34 = vld [vmem:[%s2108_s5 + $0xf8] sm:$0xff]  ;;  %v1614_v35 = vld [vmem:[%s2108_s5 + $0xe0] sm:$0xff]  ;;  %v1616_v36 = vld [vmem:[%s2108_s5 + $0xf0] sm:$0xff] }
   0xd   :  { %1231 = vmatpush1.msra.mxu0 %v1626_v23  ;;  %1320 = vmatpush1.msra.mxu1 %v1628_v24  ;;  %v1611_v38 = vld [vmem:[%s2108_s5 + $0xc8] sm:$0xff]  ;;  %v1613_v39 = vld [vmem:[%s2108_s5 + $0xd8] sm:$0xff]  ;;  %v1610_v40 = vld [vmem:[%s2108_s5 + $0xc0] sm:$0xff] }
   0xe   :  { %1232 = vmatprep.subr.mxu0 %v1623_v25  ;;  %1321 = vmatprep.subr.mxu1 %v1625_v26  ;;  %v1612_v41 = vld [vmem:[%s2108_s5 + $0xd0] sm:$0xff]  ;;  %v1607_v42 = vld [vmem:[%s2108_s5 + $0xa8] sm:$0xff]  ;;  %v1609_v43 = vld [vmem:[%s2108_s5 + $0xb8] sm:$0xff] }
   0xf   :  { %1233 = vmatpush1.msra.mxu0 %v1622_v27  ;;  %1322 = vmatpush1.msra.mxu1 %v1624_v28  ;;  %v1606_v44 = vld [vmem:[%s2108_s5 + $0xa0] sm:$0xff]  ;;  %v1608_v45 = vld [vmem:[%s2108_s5 + $0xb0] sm:$0xff]  ;;  %v1603_v47 = vld [vmem:[%s2108_s5 + $0x88] sm:$0xff] }
  0x10   :  { %1234 = vmatprep.subr.mxu0 %v1619_v29  ;;  %1323 = vmatprep.subr.mxu1 %v1621_v30  ;;  %v1605_v48 = vld [vmem:[%s2108_s5 + $0x98] sm:$0xff]  ;;  %v1602_v49 = vld [vmem:[%s2108_s5 + $0x80] sm:$0xff]  ;;  %v1604_v50 = vld [vmem:[%s2108_s5 + $0x90] sm:$0xff] }
  0x11   :  { %1235 = vmatpush1.msra.mxu0 %v1618_v31  ;;  %1324 = vmatpush1.msra.mxu1 %v1620_v32  ;;  %v1599_v51 = vld [vmem:[%s2108_s5 + $0x68] sm:$0xff]  ;;  %v1601_v52 = vld [vmem:[%s2108_s5 + $0x78] sm:$0xff]  ;;  %v1598_v53 = vld [vmem:[%s2108_s5 + $0x60] sm:$0xff] }
  0x12   :  { %1236 = vmatprep.subr.mxu0 %v1615_v33  ;;  %1325 = vmatprep.subr.mxu1 %v1617_v34  ;;  %v1600_v54 = vld [vmem:[%s2108_s5 + $0x70] sm:$0xff]  ;;  %v1595_v56 = vld [vmem:[%s2108_s5 + $0x48] sm:$0xff]  ;;  %v1597_v57 = vld [vmem:[%s2108_s5 + $0x58] sm:$0xff] }
  0x13   :  { %1237 = vmatpush1.msra.mxu0 %v1614_v35  ;;  %1326 = vmatpush1.msra.mxu1 %v1616_v36  ;;  %v1594_v58 = vld [vmem:[%s2108_s5 + $0x40] sm:$0xff]  ;;  %v1596_v59 = vld [vmem:[%s2108_s5 + $0x50] sm:$0xff]  ;;  %v1591_v60 = vld [vmem:[%s2108_s5 + $0x28] sm:$0xff] }
  0x14   :  { %1238 = vmatprep.subr.mxu0 %v1611_v38  ;;  %1327 = vmatprep.subr.mxu1 %v1613_v39  ;;  %v1593_v61 = vld [vmem:[%s2108_s5 + $0x38] sm:$0xff]  ;;  %v1590_v62 = vld [vmem:[%s2108_s5 + $0x20] sm:$0xff]  ;;  %v1592_v63 = vld [vmem:[%s2108_s5 + $0x30] sm:$0xff] }
  0x15   :  { %1239 = vmatpush1.msra.mxu0 %v1610_v40  ;;  %1328 = vmatpush1.msra.mxu1 %v1612_v41  ;;  %v1587_v1 = vld [vmem:[%s2108_s5 + $0x8] sm:$0xff]  ;;  %v1681_v3 = vld [vmem:[%s2108_s5 + $0x2f8] sm:$0xff]  ;;  %v1678_v5 = vld [vmem:[%s2108_s5 + $0x2e0] sm:$0xff] }
  0x16   :  { %1240 = vmatprep.subr.mxu0 %v1607_v42  ;;  %1329 = vmatprep.subr.mxu1 %v1609_v43  ;;  %v1679_v2 = vld [vmem:[%s2108_s5 + $0x2e8] sm:$0xff]  ;;  %v1589_v4 = vld [vmem:[%s2108_s5 + $0x18] sm:$0xff]  ;;  %v1680_v6 = vld [vmem:[%s2108_s5 + $0x2f0] sm:$0xff]  ;;  %v1074_v10 = vsel %vm1040_vm0, %v1681_v3, %v1743_v0  ;;  %v1041_v11 = vsel %vm1040_vm0, %v1678_v5, %v1743_v0 }
  0x17   :  { %1241 = vmatpush1.msra.mxu0 %v1606_v44  ;;  %1330 = vmatpush1.msra.mxu1 %v1608_v45  ;;  %v25_v7 = vld [vmem:[%s2108_s5] sm:$0xff]  ;;  %v1588_v8 = vld [vmem:[%s2108_s5 + $0x10] sm:$0xff]  ;;  %v1052_v9 = vsel %vm1040_vm0, %v1679_v2, %v1743_v0  ;;  %v1063_v12 = vsel %vm1040_vm0, %v1680_v6, %v1743_v0  ;;  %v1675_v13 = vld [vmem:[%s2108_s5 + $0x2c8] sm:$0xff] }
  0x18   :  { %1242 = vmatprep.subr.mxu0 %v1603_v47  ;;  %1331 = vmatprep.subr.mxu1 %v1605_v48  ;;  %v1677_v14 = vld [vmem:[%s2108_s5 + $0x2d8] sm:$0xff]  ;;  %v1674_v15 = vld [vmem:[%s2108_s5 + $0x2c0] sm:$0xff]  ;;  %v1676_v0 = vld [vmem:[%s2108_s5 + $0x2d0] sm:$0xff]  ;;  %v1698_v47 = vmov 0  }
  0x19   :  { %1243 = vmatpush1.msra.mxu0 %v1602_v49  ;;  %1332 = vmatpush1.msra.mxu1 %v1604_v50  ;;  %v1671_v16 = vld [vmem:[%s2108_s5 + $0x2a8] sm:$0xff]  ;;  %v1673_v17 = vld [vmem:[%s2108_s5 + $0x2b8] sm:$0xff]  ;;  %v1670_v18 = vld [vmem:[%s2108_s5 + $0x2a0] sm:$0xff] }
  0x1a   :  { %1244 = vmatprep.subr.mxu0 %v1599_v51  ;;  %1333 = vmatprep.subr.mxu1 %v1601_v52  ;;  %v1672_v19 = vld [vmem:[%s2108_s5 + $0x2b0] sm:$0xff]  ;;  %v1667_v20 = vld [vmem:[%s2108_s5 + $0x288] sm:$0xff]  ;;  %v1669_v21 = vld [vmem:[%s2108_s5 + $0x298] sm:$0xff] }
  0x1b   :  { %1245 = vmatpush1.msra.mxu0 %v1598_v53  ;;  %1334 = vmatpush1.msra.mxu1 %v1600_v54  ;;  %v1666_v22 = vld [vmem:[%s2108_s5 + $0x280] sm:$0xff]  ;;  %v1668_v23 = vld [vmem:[%s2108_s5 + $0x290] sm:$0xff]  ;;  %v1663_v24 = vld [vmem:[%s2108_s5 + $0x268] sm:$0xff]  ;;  %v1699_v54 = vmov 0.0  }
  0x1c   :  { %1246 = vmatprep.subr.mxu0 %v1595_v56  ;;  %1335 = vmatprep.subr.mxu1 %v1597_v57  ;;  %v1665_v25 = vld [vmem:[%s2108_s5 + $0x278] sm:$0xff]  ;;  %v1662_v26 = vld [vmem:[%s2108_s5 + $0x260] sm:$0xff]  ;;  %v1664_v27 = vld [vmem:[%s2108_s5 + $0x270] sm:$0xff] }
  0x1d   :  { %1247 = vmatpush1.msra.mxu0 %v1594_v58  ;;  %1336 = vmatpush1.msra.mxu1 %v1596_v59  ;;  %v1659_v28 = vld [vmem:[%s2108_s5 + $0x248] sm:$0xff]  ;;  %v1661_v29 = vld [vmem:[%s2108_s5 + $0x258] sm:$0xff]  ;;  %v1658_v30 = vld [vmem:[%s2108_s5 + $0x240] sm:$0xff] }
  0x1e   :  { %1248 = vmatprep.subr.mxu0 %v1591_v60  ;;  %1337 = vmatprep.subr.mxu1 %v1593_v61  ;;  %v1660_v31 = vld [vmem:[%s2108_s5 + $0x250] sm:$0xff]  ;;  %v1655_v32 = vld [vmem:[%s2108_s5 + $0x228] sm:$0xff]  ;;  %v1657_v33 = vld [vmem:[%s2108_s5 + $0x238] sm:$0xff] }
  0x1f   :  { %1249 = vmatpush1.msra.mxu0 %v1590_v62  ;;  %1338 = vmatpush1.msra.mxu1 %v1592_v63  ;;  %v1654_v34 = vld [vmem:[%s2108_s5 + $0x220] sm:$0xff]  ;;  %v1656_v35 = vld [vmem:[%s2108_s5 + $0x230] sm:$0xff]  ;;  %v1651_v36 = vld [vmem:[%s2108_s5 + $0x208] sm:$0xff] }
  0x20   :  { %1250 = vmatprep.subr.mxu0 %v1587_v1  ;;  %1339 = vmatprep.subr.mxu1 %v1589_v4  ;;  %v1653_v37 = vld [vmem:[%s2108_s5 + $0x218] sm:$0xff]  ;;  %v1650_v38 = vld [vmem:[%s2108_s5 + $0x200] sm:$0xff]  ;;  %v1080_v39 = vld [vmem:[%s2104_s1 + $0x8] sm:$0xff] }
  0x21   :  { %1251 = vmatpush1.msra.mxu0 %v25_v7  ;;  %1340 = vmatpush1.msra.mxu1 %v1588_v8  ;;  %v1652_v40 = vld [vmem:[%s2108_s5 + $0x210] sm:$0xff]  ;;  %v1079_v41 = vld [vmem:[%s2104_s1] sm:$0xff]  ;;  %v1082_v42 = vld [vmem:[%s2104_s1 + $0x18] sm:$0xff] }
  0x22   :  { %1268 = vmatprep.subr.mxu0 %v1052_v9  ;;  %1357 = vmatprep.subr.mxu1 %v1074_v10  ;;  %v1184_v43 = vld [vmem:[%s2105_s2 + $0x8] sm:$0xff]  ;;  %v1186_v44 = vld [vmem:[%s2105_s2 + $0x18] sm:$0xff]  ;;  %v1081_v45 = vld [vmem:[%s2104_s1 + $0x10] sm:$0xff] }
  0x23   :  { %1269 = vmatpush2.msra.mxu0 %v1041_v11  ;;  %1358 = vmatpush2.msra.mxu1 %v1063_v12  ;;  %v1084_v46 = vld [vmem:[%s2104_s1 + $0x28] sm:$0xff]  ;;  %v1183_v48 = vld [vmem:[%s2105_s2] sm:$0xff]  ;;  %v1185_v49 = vld [vmem:[%s2105_s2 + $0x10] sm:$0xff] }
  0x24   :  { %1270 = vmatprep.subr.mxu0 %v1675_v13  ;;  %1359 = vmatprep.subr.mxu1 %v1677_v14  ;;  %v1083_v50 = vld [vmem:[%s2104_s1 + $0x20] sm:$0xff]  ;;  %v1086_v51 = vld [vmem:[%s2104_s1 + $0x38] sm:$0xff]  ;;  %v1085_v53 = vld [vmem:[%s2104_s1 + $0x30] sm:$0xff] }
  0x25   :  { %1271 = vmatpush2.msra.mxu0 %v1674_v15  ;;  %1360 = vmatpush2.msra.mxu1 %v1676_v0  ;;  %v1415_v52 = vld [vmem:[%s2107_s4] sm:$0xf] }
  0x26   :  { %1272 = vmatprep.subr.mxu0 %v1671_v16  ;;  %1361 = vmatprep.subr.mxu1 %v1673_v17 }
  0x27   :  { %1273 = vmatpush2.msra.mxu0 %v1670_v18  ;;  %1362 = vmatpush2.msra.mxu1 %v1672_v19 }
  0x28   :  { %1274 = vmatprep.subr.mxu0 %v1667_v20  ;;  %1363 = vmatprep.subr.mxu1 %v1669_v21 }
  0x29   :  { %1275 = vmatpush2.msra.mxu0 %v1666_v22  ;;  %1364 = vmatpush2.msra.mxu1 %v1668_v23 }
  0x2a   :  { %1276 = vmatprep.subr.mxu0 %v1663_v24  ;;  %1365 = vmatprep.subr.mxu1 %v1665_v25 }
  0x2b   :  { %1277 = vmatpush2.msra.mxu0 %v1662_v26  ;;  %1366 = vmatpush2.msra.mxu1 %v1664_v27 }
  0x2c   :  { %1278 = vmatprep.subr.mxu0 %v1659_v28  ;;  %1367 = vmatprep.subr.mxu1 %v1661_v29 }
  0x2d   :  { %1279 = vmatpush2.msra.mxu0 %v1658_v30  ;;  %1368 = vmatpush2.msra.mxu1 %v1660_v31 }
  0x2e   :  { %1280 = vmatprep.subr.mxu0 %v1655_v32  ;;  %1369 = vmatprep.subr.mxu1 %v1657_v33 }
  0x2f   :  { %1281 = vmatpush2.msra.mxu0 %v1654_v34  ;;  %1370 = vmatpush2.msra.mxu1 %v1656_v35 }
  0x30   :  { %1282 = vmatprep.subr.mxu0 %v1651_v36  ;;  %1371 = vmatprep.subr.mxu1 %v1653_v37 }
  0x31   :  { %1283 = vmatpush2.msra.mxu0 %v1650_v38  ;;  %1682 = vmatprep.mubr.msk.f32.mxu0 %vm1207_vm1, %v1080_v39 }
  0x32   :  { %1372 = vmatpush2.msra.mxu1 %v1652_v40  ;;  %1686 = vmatprep.mubr.msk.f32.mxu1 %vm1207_vm1, %v1080_v39 }
  0x33   :  { %1285 = vmatmul.mubr.f32.vlgmr.msra.gmra.mxu0 %v1079_v41  ;;  %1374 = vmatmul.mubr.f32.vlgmr.msra.gmra.mxu1 %v1079_v41 }
  0x34   :  { %1683 = vmatprep.mubr.msk.f32.mxu0 %vm1207_vm1, %v1082_v42  ;;  %1687 = vmatprep.mubr.msk.f32.mxu1 %vm1207_vm1, %v1082_v42 }
  0x35   :  { %1697 = vset.pattern.permute.xlu1 %v1698_v47  ;;  %1696 = vset.pattern.permute.xlu0 %v1698_v47 }
  0x36   :  { %1194 = vperm.xlu1 %1697, %v1184_v43   ;;  %1204 = vperm.xlu0 %1696, %v1186_v44   ;;  %v1414_v43 = vld [vmem:[%s2106_s3] sm:$0xf] }
  0x37   :  { %1291 = vmatmul.mubr.f32.gmra.mxu0 %v1081_v45  ;;  %1380 = vmatmul.mubr.f32.gmra.mxu1 %v1081_v45 }
  0x38   :  { %1684 = vmatprep.mubr.msk.f32.mxu0 %vm1207_vm1, %v1084_v46  ;;  %1688 = vmatprep.mubr.msk.f32.mxu1 %vm1207_vm1, %v1084_v46 }
  0x3a   :  { %1189 = vperm.xlu1 %1697, %v1183_v48   ;;  %1199 = vperm.xlu0 %1696, %v1185_v49  }
  0x3b   :  { %1297 = vmatmul.mubr.f32.gmra.mxu0 %v1083_v50  ;;  %1386 = vmatmul.mubr.f32.gmra.mxu1 %v1083_v50 }
  0x3c   :  { %1685 = vmatprep.mubr.msk.f32.mxu0 %vm1207_vm1, %v1086_v51  ;;  %1689 = vmatprep.mubr.msk.f32.mxu1 %vm1207_vm1, %v1086_v51 }
  0x3e   :  { %1418 = vperm.xlu0 %1696, %v1415_v52  }
  0x3f   :  { %1303 = vmatmul.mubr.f32.gmra.mxu0 %v1085_v53  ;;  %1392 = vmatmul.mubr.f32.gmra.mxu1 %v1085_v53  ;;  %v1567_v53 = vld [vmem:[%s2103_s0] sm:$0xff] }
  0x40   :  { %1489 = vmatprep.mubr.f32.mxu0 %v1699_v54  ;;  %1560 = vmatprep.mubr.f32.mxu1 %v1699_v54  ;;  %v1692_v54 = vld [vmem:[%s2103_s0 + $0x8] sm:$0xff] }
  0xb1   :  { %v1205_v63 = vpop.permute.xlu0 %1204  ;;  %v1195_v5 = vpop.permute.xlu1 %1194 }
  0xb5   :  { %v1200_v8 = vpop.permute.xlu0 %1199  ;;  %v1190_v18 = vpop.permute.xlu1 %1189 }
  0xb9   :  { %v1419_v46 = vpop.permute.xlu0 %1418 }
  0xf3   :  { %v1286_v55 = vpop.f32.mrf.mxu0  ;;  %v1375_v56 = vpop.f32.mrf.mxu1 }
  0xf4   :  { %v1287_v31 = vadd.f32 %v1286_v55, %v1190_v18  ;;  %v1376_v32 = vadd.f32 %v1375_v56, %v1190_v18 }
  0xf5   :  { %v1288_v57 = vpop.f32.mrf.mxu0  ;;  %v1377_v58 = vpop.f32.mrf.mxu1 }
  0xf6   :  { %v1289_v27 = vadd.f32 %v1288_v57, %v1190_v18  ;;  %v1378_v28 = vadd.f32 %v1377_v58, %v1190_v18  ;;  %v1398_v41 = vmax.f32 %v1287_v31, 0.0  ;;  %v1400_v42 = vmax.f32 %v1376_v32, 0.0 }
  0xf7   :  { %v1292_v59 = vpop.f32.mrf.mxu0  ;;  %v1381_v60 = vpop.f32.mrf.mxu1 }
  0xf8   :  { %v1293_v23 = vadd.f32 %v1292_v59, %v1195_v5  ;;  %v1382_v24 = vadd.f32 %v1381_v60, %v1195_v5  ;;  %v1399_v39 = vmax.f32 %v1289_v27, 0.0  ;;  %v1401_v40 = vmax.f32 %v1378_v28, 0.0 }
  0xf9   :  { %v1294_v61 = vpop.f32.mrf.mxu0  ;;  %v1383_v62 = vpop.f32.mrf.mxu1 }
  0xfa   :  { %v1295_v19 = vadd.f32 %v1294_v61, %v1195_v5  ;;  %v1384_v20 = vadd.f32 %v1383_v62, %v1195_v5  ;;  %v1402_v37 = vmax.f32 %v1293_v23, 0.0  ;;  %v1404_v38 = vmax.f32 %v1382_v24, 0.0 }
  0xfb   :  { %v1298_v1 = vpop.f32.mrf.mxu0  ;;  %v1387_v2 = vpop.f32.mrf.mxu1 }
  0xfc   :  { %v1299_v16 = vadd.f32 %v1298_v1, %v1200_v8  ;;  %v1388_v17 = vadd.f32 %v1387_v2, %v1200_v8  ;;  %v1403_v35 = vmax.f32 %v1295_v19, 0.0  ;;  %v1405_v36 = vmax.f32 %v1384_v20, 0.0 }
  0xfd   :  { %v1300_v3 = vpop.f32.mrf.mxu0  ;;  %v1389_v4 = vpop.f32.mrf.mxu1 }
  0xfe   :  { %v1301_v13 = vadd.f32 %v1300_v3, %v1200_v8  ;;  %v1390_v14 = vadd.f32 %v1389_v4, %v1200_v8  ;;  %v1406_v33 = vmax.f32 %v1299_v16, 0.0  ;;  %v1408_v34 = vmax.f32 %v1388_v17, 0.0 }
  0xff   :  { %v1304_v6 = vpop.f32.mrf.mxu0  ;;  %v1393_v7 = vpop.f32.mrf.mxu1 }
 0x100   :  { %v1305_v9 = vadd.f32 %v1304_v6, %v1205_v63  ;;  %v1394_v10 = vadd.f32 %v1393_v7, %v1205_v63  ;;  %v1407_v29 = vmax.f32 %v1301_v13, 0.0  ;;  %v1409_v30 = vmax.f32 %v1390_v14, 0.0 }
 0x101   :  { %v1306_v11 = vpop.f32.mrf.mxu0  ;;  %v1395_v12 = vpop.f32.mrf.mxu1 }
 0x102   :  { %v1307_v15 = vadd.f32 %v1306_v11, %v1205_v63  ;;  %v1396_v0 = vadd.f32 %v1395_v12, %v1205_v63  ;;  %v1410_v25 = vmax.f32 %v1305_v9, 0.0  ;;  %v1412_v26 = vmax.f32 %v1394_v10, 0.0 }
 0x104   :  { %v1411_v21 = vmax.f32 %v1307_v15, 0.0  ;;  %v1413_v22 = vmax.f32 %v1396_v0, 0.0 }
 0x106   :  { %1449 = vmatprep.subr.mxu0 %v1411_v21  ;;  %1520 = vmatprep.subr.mxu1 %v1413_v22 }
 0x107   :  { %1450 = vmatpush1.msra.mxu0 %v1410_v25  ;;  %1521 = vmatpush1.msra.mxu1 %v1412_v26 }
 0x108   :  { %1451 = vmatprep.subr.mxu0 %v1407_v29  ;;  %1522 = vmatprep.subr.mxu1 %v1409_v30 }
 0x109   :  { %1452 = vmatpush1.msra.mxu0 %v1406_v33  ;;  %1523 = vmatpush1.msra.mxu1 %v1408_v34 }
 0x10a   :  { %1453 = vmatprep.subr.mxu0 %v1403_v35  ;;  %1524 = vmatprep.subr.mxu1 %v1405_v36 }
 0x10b   :  { %1454 = vmatpush1.msra.mxu0 %v1402_v37  ;;  %1525 = vmatpush1.msra.mxu1 %v1404_v38 }
 0x10c   :  { %1455 = vmatprep.subr.mxu0 %v1399_v39  ;;  %1526 = vmatprep.subr.mxu1 %v1401_v40 }
 0x10d   :  { %1456 = vmatpush1.msra.mxu0 %v1398_v41  ;;  %1527 = vmatpush1.msra.mxu1 %v1400_v42 }
 0x10e   :  { %1690 = vmatmul.mubr.msk.f32.vlgmr.msra.gmra.mxu0 %vm1421_vm2, %v1414_v43  ;;  %1691 = vmatmul.mubr.msk.f32.vlgmr.msra.gmra.mxu1 %vm1421_vm2, %v1414_v43 }
 0x1ce   :  { %v1491_v44 = vpop.f32.mrf.mxu0  ;;  %v1562_v45 = vpop.f32.mrf.mxu1 }
 0x1cf   :  { %v1492_v49 = vadd.f32 %v1491_v44, %v1419_v46  ;;  %v1563_v50 = vadd.f32 %v1562_v45, %v1419_v46 }
 0x1d0   :  { %v1493_v47 = vpop.f32.mrf.mxu0  ;;  %v1564_v48 = vpop.f32.mrf.mxu1 }
 0x1d1   :  { %v1494_v51 = vadd.f32 %v1493_v47, %v1419_v46  ;;  %v1565_v52 = vadd.f32 %v1564_v48, %v1419_v46 }
 0x1d3   :  { %v1570_v55 = vcombine.low %v1492_v49, %v1494_v51  ;;  %v1578_v56 = vcombine.low %v1563_v50, %v1565_v52 }
 0x1d5   :  { %v1572_v57 = vadd.f32 %v1570_v55, %v1567_v53  ;;  %v1580_v58 = vadd.f32 %v1692_v54, %v1578_v56 }
 0x1d7   :  { %1573 = vst [vmem:[%s2110_s7] sm:$0xff] %v1572_v57  ;;  %1693 = vst [vmem:[%s2110_s7 + $0x8] sm:$0xff] %v1580_v58 }

</bundles_post_ra>
